<compile_context>
chip_gen: v7x
topology: tpu7x:2x2x1
jax: 0.10.0
libtpu: 0.0.40
codegen_flags: <defaults>
</compile_context>

<pallas_src>
import functools

import jax
import jax.numpy as jnp
from jax.experimental import pallas as pl
from jax.experimental.pallas import tpu as pltpu


def _round_up(n, m):
    return ((n + m - 1) // m) * m


# ---------------------------------------------------------------------------
# Kernel
# ---------------------------------------------------------------------------
def _cvae_kernel(
    x_ref, c_ref, eps_ref,
    w1x_ref, w1c_ref, b1_ref,
    w2_ref, b2_ref,
    wh_ref, bh_ref,
    w3z_ref, w3c_ref, b3_ref,
    w4_ref, b4_ref,
    w5_ref, b5_ref,
    recon_ref, mlv_ref,
    *, latent_dim, lat_half,
):
    f32 = jnp.float32
    bf16 = jnp.bfloat16

    x = x_ref[...]        # (tb, input_dim),  bf16
    c = c_ref[...]        # (tb, cond_dim),   bf16
    eps = eps_ref[...]    # (tb, latent_dim), f32

    # ---- encode ----
    h1 = (jnp.dot(x, w1x_ref[...], preferred_element_type=f32)
          + jnp.dot(c, w1c_ref[...], preferred_element_type=f32)
          + b1_ref[...])
    h1 = jnp.maximum(h1, 0.0).astype(bf16)

    h2 = jnp.dot(h1, w2_ref[...], preferred_element_type=f32) + b2_ref[...]
    h2 = jnp.maximum(h2, 0.0).astype(bf16)

    # Fused mu/logvar head.  Layout of `mlv` (single lane-dense slab, width 2*lat_half):
    #   lanes [0         : latent_dim)            -> mu
    #   lanes [lat_half  : lat_half + latent_dim) -> logvar
    #   everything else                           -> exact zeros (zero-padded weights)
    mlv = jnp.dot(h2, wh_ref[...], preferred_element_type=f32) + bh_ref[...]

    mu = mlv[:, :latent_dim]
    logvar = mlv[:, lat_half:lat_half + latent_dim]

    # ---- reparameterize (f32 elementwise) ----
    z = mu + eps * jnp.exp(0.5 * logvar)

    # ---- decode ----
    h3 = (jnp.dot(z.astype(bf16), w3z_ref[...], preferred_element_type=f32)
          + jnp.dot(c, w3c_ref[...], preferred_element_type=f32)
          + b3_ref[...])
    h3 = jnp.maximum(h3, 0.0).astype(bf16)

    h4 = jnp.dot(h3, w4_ref[...], preferred_element_type=f32) + b4_ref[...]
    h4 = jnp.maximum(h4, 0.0).astype(bf16)

    logits = jnp.dot(h4, w5_ref[...], preferred_element_type=f32) + b5_ref[...]

    recon_ref[...] = jax.nn.sigmoid(logits).astype(recon_ref.dtype)
    mlv_ref[...] = mlv


# ---------------------------------------------------------------------------
# Wrapper
# ---------------------------------------------------------------------------
def cvae_forward(x, c, eps, packed, *, block_b=None, recon_dtype=jnp.float32):
    """Runs the full CVAE forward pass in one batch-tiled fused Pallas kernel.

    block_b=None  -> single grid step over the whole batch (best on 1-TC v5e/v6e).
    block_b=k     -> batch tiled into blocks of k rows (rounded up to 16); pick a k
                     that divides the batch (e.g. ceil(B/2) rounded to 16 on v7x) so
                     no padded rows are ever computed or written.
    """
    B, input_dim = x.shape
    cond_dim = c.shape[1]
    latent_dim = eps.shape[1]
    headp = packed["w_head"].shape[1]
    lat_half = headp // 2

    # bf16 activations for the MXU; eps stays f32 (used only elementwise).
    x_b = x.astype(jnp.bfloat16)
    c_b = c.astype(jnp.bfloat16)
    eps_f = eps.astype(jnp.float32)

    # block_b: multiple of 16 (bf16 sublane packing), ideally an exact divisor of B.
    bp16 = _round_up(B, 16)
    if block_b is None:
        block_b = bp16
    block_b = min(_round_up(block_b, 16), bp16)
    bp = _round_up(B, block_b)
    if bp != B:   # only hit when B is not a multiple of block_b
        pad_rows = bp - B
        x_b = jnp.pad(x_b, ((0, pad_rows), (0, 0)))
        c_b = jnp.pad(c_b, ((0, pad_rows), (0, 0)))
        eps_f = jnp.pad(eps_f, ((0, pad_rows), (0, 0)))

    grid = (bp // block_b,)

    def rows(i):        # activation / output blocks stream over the batch axis
        return (i, 0)

    def const(i):       # weights stay resident (same block every step -> no re-DMA)
        return (0, 0)

    weights = (
        packed["w1x"], packed["w1c"], packed["b1"],
        packed["w2"], packed["b2"],
        packed["w_head"], packed["b_head"],
        packed["w3z"], packed["w3c"], packed["b3"],
        packed["w4"], packed["b4"],
        packed["w5"], packed["b5"],
    )

    in_specs = [
        pl.BlockSpec((block_b, input_dim), rows),
        pl.BlockSpec((block_b, cond_dim), rows),
        pl.BlockSpec((block_b, latent_dim), rows),
    ] + [pl.BlockSpec(w.shape, const) for w in weights]

    out_specs = (
        pl.BlockSpec((block_b, input_dim), rows),
        pl.BlockSpec((block_b, headp), rows),
    )
    out_shape = (
        jax.ShapeDtypeStruct((bp, input_dim), recon_dtype),   # recon
        jax.ShapeDtypeStruct((bp, headp), jnp.float32),       # [mu | logvar] slab
    )

    kernel = functools.partial(_cvae_kernel, latent_dim=latent_dim, lat_half=lat_half)

    recon_p, mlv_p = pl.pallas_call(
        kernel,
        out_shape=out_shape,
        grid_spec=pltpu.PrefetchScalarGridSpec(
            num_scalar_prefetch=0,
            grid=grid,
            in_specs=in_specs,
            out_specs=out_specs,
        ),
        compiler_params=pltpu.CompilerParams(
            dimension_semantics=("parallel",)),
    )(x_b, c_b, eps_f, *weights)

    recon = recon_p[:B]
    mu = mlv_p[:B, :latent_dim]
    logvar = mlv_p[:B, lat_half:lat_half + latent_dim]
    return recon, mu, logvar


# ---------------------------------------------------------------------------
# Parameter construction / packing
# ---------------------------------------------------------------------------
def init_params(key, input_dim, latent_dim, cond_dim):
    """f32 parameters matching nn.Linear semantics, stored pre-transposed as [in, out]."""
    hid1 = int(input_dim * 0.5)
    hid2 = int(hid1 * 0.5)

    def linear(k, fan_in, fan_out):
        kw, kb = jax.random.split(k)
        s = 1.0 / jnp.sqrt(fan_in)
        w = jax.random.uniform(kw, (fan_in, fan_out), jnp.float32, -s, s)
        b = jax.random.uniform(kb, (1, fan_out), jnp.float32, -s, s)
        return w, b

    ks = jax.random.split(key, 7)
    w1, b1 = linear(ks[0], input_dim + cond_dim, hid1)
    w2, b2 = linear(ks[1], hid1, hid2)
    w21, b21 = linear(ks[2], hid2, latent_dim)
    w22, b22 = linear(ks[3], hid2, latent_dim)
    w3, b3 = linear(ks[4], latent_dim + cond_dim, hid2)
    w4, b4 = linear(ks[5], hid2, hid1)
    w5, b5 = linear(ks[6], hid1, input_dim)
    return dict(w1=w1, b1=b1, w2=w2, b2=b2, w21=w21, b21=b21, w22=w22, b22=b22,
                w3=w3, b3=b3, w4=w4, b4=b4, w5=w5, b5=b5)


def pack_params(p, input_dim, latent_dim, cond_dim):
    """Pack/pad params into the kernel layout: bf16 weights, f32 biases, matmul N dims
    zero-padded to multiples of 128 lanes, fc1 split into x/c halves, mu/logvar head
    fused into a single 2*lat_half-lane slab (128 lanes when latent_dim <= 64)."""
    hid1 = p["w1"].shape[1]
    hid2 = p["w2"].shape[1]
    hid1p = _round_up(hid1, 128)
    hid2p = _round_up(hid2, 128)
    lat_half = _round_up(latent_dim, 64)   # 2*lat_half is a multiple of 128 lanes

    def pad(a, rows, cols):
        return jnp.pad(a, ((0, rows - a.shape[0]), (0, cols - a.shape[1])))

    bf16 = jnp.bfloat16
    # Head: mu weights in lanes [0:lat_half), logvar weights in lanes [lat_half:2*lat_half).
    w_head = jnp.concatenate(
        [pad(p["w21"], hid2p, lat_half), pad(p["w22"], hid2p, lat_half)], axis=1)
    b_head = jnp.concatenate(
        [pad(p["b21"], 1, lat_half), pad(p["b22"], 1, lat_half)], axis=1)

    return dict(
        w1x=pad(p["w1"][:input_dim], input_dim, hid1p).astype(bf16),
        w1c=pad(p["w1"][input_dim:], cond_dim, hid1p).astype(bf16),
        b1=pad(p["b1"], 1, hid1p),
        w2=pad(p["w2"], hid1p, hid2p).astype(bf16),
        b2=pad(p["b2"], 1, hid2p),
        w_head=w_head.astype(bf16),
        b_head=b_head,
        w3z=pad(p["w3"][:latent_dim], latent_dim, hid2p).astype(bf16),
        w3c=pad(p["w3"][latent_dim:], cond_dim, hid2p).astype(bf16),
        b3=pad(p["b3"], 1, hid2p),
        w4=pad(p["w4"], hid2p, hid1p).astype(bf16),
        b4=pad(p["b4"], 1, hid1p),
        w5=pad(p["w5"], hid1p, input_dim).astype(bf16),
        b5=p["b5"],
    )


# ---------------------------------------------------------------------------
# References
# ---------------------------------------------------------------------------
def cvae_forward_ref_f32(x, c, eps, p):
    """Pure-JAX f32 reference mirroring the PyTorch forward exactly."""
    h1 = jax.nn.relu(jnp.concatenate([x, c], axis=1) @ p["w1"] + p["b1"])
    h2 = jax.nn.relu(h1 @ p["w2"] + p["b2"])
    mu = h2 @ p["w21"] + p["b21"]
    logvar = h2 @ p["w22"] + p["b22"]
    z = mu + eps * jnp.exp(0.5 * logvar)
    h3 = jax.nn.relu(jnp.concatenate([z, c], axis=1) @ p["w3"] + p["b3"])
    h4 = jax.nn.relu(h3 @ p["w4"] + p["b4"])
    recon = jax.nn.sigmoid(h4 @ p["w5"] + p["b5"])
    return recon, mu, logvar


def cvae_forward_ref_bf16(x, c, eps, p, input_dim, latent_dim):
    """Reference matching the kernel's numerics (bf16 matmuls with f32 accumulation,
    split x/c and z/c matmuls, f32 elementwise) for a tight correctness check."""
    bf16 = jnp.bfloat16

    def mm(a, w):
        return jnp.dot(a.astype(bf16), w.astype(bf16),
                       preferred_element_type=jnp.float32)

    h1 = jax.nn.relu(mm(x, p["w1"][:input_dim]) + mm(c, p["w1"][input_dim:]) + p["b1"])
    h2 = jax.nn.relu(mm(h1, p["w2"]) + p["b2"])
    mu = mm(h2, p["w21"]) + p["b21"]
    logvar = mm(h2, p["w22"]) + p["b22"]
    z = mu + eps * jnp.exp(0.5 * logvar)
    h3 = jax.nn.relu(mm(z, p["w3"][:latent_dim]) + mm(c, p["w3"][latent_dim:]) + p["b3"])
    h4 = jax.nn.relu(mm(h3, p["w4"]) + p["b4"])
    recon = jax.nn.sigmoid(mm(h4, p["w5"]) + p["b5"])
    return recon, mu, logvar


# ---------------------------------------------------------------------------
# Main
# ---------------------------------------------------------------------------
if __name__ == "__main__":
    # Small shapes consistent with the module.
    batch = 32
    input_dim = 64        # -> hid1 = 32, hid2 = 16
    latent_dim = 16
    cond_dim = 8

    key = jax.random.PRNGKey(0)
    kx, kc, keps, kp = jax.random.split(key, 4)
    x = jax.random.uniform(kx, (batch, input_dim), jnp.float32)
    c = jax.random.uniform(kc, (batch, cond_dim), jnp.float32)
    eps = jax.random.normal(keps, (batch, latent_dim), jnp.float32)

    params = init_params(kp, input_dim, latent_dim, cond_dim)
    packed = pack_params(params, input_dim, latent_dim, cond_dim)

    # block_b=16 divides batch=32 exactly -> two full (unpadded) grid steps that a
    # dual-TC chip (v7x) splits across cores; on single-TC v5e/v6e pass block_b=None
    # for one grid step over the whole batch.
    fwd = jax.jit(functools.partial(cvae_forward, block_b=16))
    recon, mu, logvar = jax.block_until_ready(fwd(x, c, eps, packed))

    assert recon.shape == (batch, input_dim)
    assert mu.shape == (batch, latent_dim)
    assert logvar.shape == (batch, latent_dim)

    # Tight check vs the reference that uses the same numerics as the kernel.
    r_m, m_m, lv_m = cvae_forward_ref_bf16(x, c, eps, params, input_dim, latent_dim)
    assert jnp.allclose(recon, r_m, atol=3e-3, rtol=3e-3)
    assert jnp.allclose(mu, m_m, atol=3e-3, rtol=3e-3)
    assert jnp.allclose(logvar, lv_m, atol=3e-3, rtol=3e-3)

    # Loose check vs the full-f32 PyTorch-equivalent math.
    r_f, m_f, lv_f = cvae_forward_ref_f32(x, c, eps, params)
    assert jnp.allclose(recon, r_f, atol=5e-2, rtol=5e-2)
    assert jnp.allclose(mu, m_f, atol=5e-2, rtol=5e-2)
    assert jnp.allclose(logvar, lv_f, atol=5e-2, rtol=5e-2)

    print("KERNEL_OK")
</pallas_src>

<mosaic_0001>
module attributes {stable_mosaic.version = 11 : i64} {
  func.func @_cvae_kernel(%arg0: i32, %arg1: memref<16x64xbf16, #tpu.memory_space<vmem>>, %arg2: memref<16x8xbf16, #tpu.memory_space<vmem>>, %arg3: memref<16x16xf32, #tpu.memory_space<vmem>>, %arg4: memref<64x128xbf16, #tpu.memory_space<vmem>>, %arg5: memref<8x128xbf16, #tpu.memory_space<vmem>>, %arg6: memref<1x128xf32, #tpu.memory_space<vmem>>, %arg7: memref<128x128xbf16, #tpu.memory_space<vmem>>, %arg8: memref<1x128xf32, #tpu.memory_space<vmem>>, %arg9: memref<128x128xbf16, #tpu.memory_space<vmem>>, %arg10: memref<1x128xf32, #tpu.memory_space<vmem>>, %arg11: memref<16x128xbf16, #tpu.memory_space<vmem>>, %arg12: memref<8x128xbf16, #tpu.memory_space<vmem>>, %arg13: memref<1x128xf32, #tpu.memory_space<vmem>>, %arg14: memref<128x128xbf16, #tpu.memory_space<vmem>>, %arg15: memref<1x128xf32, #tpu.memory_space<vmem>>, %arg16: memref<128x64xbf16, #tpu.memory_space<vmem>>, %arg17: memref<1x64xf32, #tpu.memory_space<vmem>>, %arg18: memref<16x64xf32, #tpu.memory_space<vmem>>, %arg19: memref<16x128xf32, #tpu.memory_space<vmem>>) attributes {dimension_semantics = [#tpu.dimension_semantics<parallel>], iteration_bounds = array<i64: 2>, scalar_prefetch = 0 : i64, scratch_operands = 0 : i64, tpu.core_type = #tpu.core_type<tc>, window_params = [{transform_indices = @transform_0, window_bounds = array<i64: 16, 64>}, {transform_indices = @transform_1, window_bounds = array<i64: 16, 8>}, {transform_indices = @transform_2, window_bounds = array<i64: 16, 16>}, {pipeline_mode = #tpu.pipeline_mode<synchronous>, transform_indices = @transform_3, window_bounds = array<i64: 64, 128>}, {pipeline_mode = #tpu.pipeline_mode<synchronous>, transform_indices = @transform_4, window_bounds = array<i64: 8, 128>}, {pipeline_mode = #tpu.pipeline_mode<synchronous>, transform_indices = @transform_5, window_bounds = array<i64: 1, 128>}, {pipeline_mode = #tpu.pipeline_mode<synchronous>, transform_indices = @transform_6, window_bounds = array<i64: 128, 128>}, {pipeline_mode = #tpu.pipeline_mode<synchronous>, transform_indices = @transform_7, window_bounds = array<i64: 1, 128>}, {pipeline_mode = #tpu.pipeline_mode<synchronous>, transform_indices = @transform_8, window_bounds = array<i64: 128, 128>}, {pipeline_mode = #tpu.pipeline_mode<synchronous>, transform_indices = @transform_9, window_bounds = array<i64: 1, 128>}, {pipeline_mode = #tpu.pipeline_mode<synchronous>, transform_indices = @transform_10, window_bounds = array<i64: 16, 128>}, {pipeline_mode = #tpu.pipeline_mode<synchronous>, transform_indices = @transform_11, window_bounds = array<i64: 8, 128>}, {pipeline_mode = #tpu.pipeline_mode<synchronous>, transform_indices = @transform_12, window_bounds = array<i64: 1, 128>}, {pipeline_mode = #tpu.pipeline_mode<synchronous>, transform_indices = @transform_13, window_bounds = array<i64: 128, 128>}, {pipeline_mode = #tpu.pipeline_mode<synchronous>, transform_indices = @transform_14, window_bounds = array<i64: 1, 128>}, {pipeline_mode = #tpu.pipeline_mode<synchronous>, transform_indices = @transform_15, window_bounds = array<i64: 128, 64>}, {pipeline_mode = #tpu.pipeline_mode<synchronous>, transform_indices = @transform_16, window_bounds = array<i64: 1, 64>}, {transform_indices = @transform_17, window_bounds = array<i64: 16, 64>}, {transform_indices = @transform_18, window_bounds = array<i64: 16, 128>}]} {
    %c0 = arith.constant 0 : index
    %c0_0 = arith.constant 0 : index
    %0 = vector.load %arg1[%c0, %c0_0] : memref<16x64xbf16, #tpu.memory_space<vmem>>, vector<16x64xbf16>
    %c0_1 = arith.constant 0 : index
    %c0_2 = arith.constant 0 : index
    %1 = vector.load %arg2[%c0_1, %c0_2] : memref<16x8xbf16, #tpu.memory_space<vmem>>, vector<16x8xbf16>
    %c0_3 = arith.constant 0 : index
    %c0_4 = arith.constant 0 : index
    %2 = vector.load %arg3[%c0_3, %c0_4] : memref<16x16xf32, #tpu.memory_space<vmem>>, vector<16x16xf32>
    %c0_5 = arith.constant 0 : index
    %c0_6 = arith.constant 0 : index
    %3 = vector.load %arg4[%c0_5, %c0_6] : memref<64x128xbf16, #tpu.memory_space<vmem>>, vector<64x128xbf16>
    %cst = arith.constant dense<0.000000e+00> : vector<16x128xf32>
    %4 = tpu.matmul %0, %3, %cst {dimension_numbers = #tpu.dot_dimension_numbers<[1], [0], [0], [1], [0, 0, 1, 1], [], []>} : vector<16x64xbf16>, vector<64x128xbf16>, vector<16x128xf32> -> vector<16x128xf32>
    %c0_7 = arith.constant 0 : index
    %c0_8 = arith.constant 0 : index
    %5 = vector.load %arg5[%c0_7, %c0_8] : memref<8x128xbf16, #tpu.memory_space<vmem>>, vector<8x128xbf16>
    %cst_9 = arith.constant dense<0.000000e+00> : vector<16x128xf32>
    %6 = tpu.matmul %1, %5, %cst_9 {dimension_numbers = #tpu.dot_dimension_numbers<[1], [0], [0], [1], [0, 0, 1, 1], [], []>} : vector<16x8xbf16>, vector<8x128xbf16>, vector<16x128xf32> -> vector<16x128xf32>
    %7 = arith.addf %4, %6 : vector<16x128xf32>
    %c0_10 = arith.constant 0 : index
    %c0_11 = arith.constant 0 : index
    %8 = vector.load %arg6[%c0_10, %c0_11] : memref<1x128xf32, #tpu.memory_space<vmem>>, vector<1x128xf32>
    %9 = vector.broadcast %8 : vector<1x128xf32> to vector<16x128xf32>
    %10 = arith.addf %7, %9 : vector<16x128xf32>
    %cst_12 = arith.constant 0.000000e+00 : f32
    %11 = vector.broadcast %cst_12 : f32 to vector<16x128xf32>
    %12 = arith.maximumf %10, %11 : vector<16x128xf32>
    %13 = arith.truncf %12 : vector<16x128xf32> to vector<16x128xbf16>
    %c0_13 = arith.constant 0 : index
    %c0_14 = arith.constant 0 : index
    %14 = vector.load %arg7[%c0_13, %c0_14] : memref<128x128xbf16, #tpu.memory_space<vmem>>, vector<128x128xbf16>
    %cst_15 = arith.constant dense<0.000000e+00> : vector<16x128xf32>
    %15 = tpu.matmul %13, %14, %cst_15 {dimension_numbers = #tpu.dot_dimension_numbers<[1], [0], [0], [1], [0, 0, 1, 1], [], []>} : vector<16x128xbf16>, vector<128x128xbf16>, vector<16x128xf32> -> vector<16x128xf32>
    %c0_16 = arith.constant 0 : index
    %c0_17 = arith.constant 0 : index
    %16 = vector.load %arg8[%c0_16, %c0_17] : memref<1x128xf32, #tpu.memory_space<vmem>>, vector<1x128xf32>
    %17 = vector.broadcast %16 : vector<1x128xf32> to vector<16x128xf32>
    %18 = arith.addf %15, %17 : vector<16x128xf32>
    %cst_18 = arith.constant 0.000000e+00 : f32
    %19 = vector.broadcast %cst_18 : f32 to vector<16x128xf32>
    %20 = arith.maximumf %18, %19 : vector<16x128xf32>
    %21 = arith.truncf %20 : vector<16x128xf32> to vector<16x128xbf16>
    %c0_19 = arith.constant 0 : index
    %c0_20 = arith.constant 0 : index
    %22 = vector.load %arg9[%c0_19, %c0_20] : memref<128x128xbf16, #tpu.memory_space<vmem>>, vector<128x128xbf16>
    %cst_21 = arith.constant dense<0.000000e+00> : vector<16x128xf32>
    %23 = tpu.matmul %21, %22, %cst_21 {dimension_numbers = #tpu.dot_dimension_numbers<[1], [0], [0], [1], [0, 0, 1, 1], [], []>} : vector<16x128xbf16>, vector<128x128xbf16>, vector<16x128xf32> -> vector<16x128xf32>
    %c0_22 = arith.constant 0 : index
    %c0_23 = arith.constant 0 : index
    %24 = vector.load %arg10[%c0_22, %c0_23] : memref<1x128xf32, #tpu.memory_space<vmem>>, vector<1x128xf32>
    %25 = vector.broadcast %24 : vector<1x128xf32> to vector<16x128xf32>
    %26 = arith.addf %23, %25 : vector<16x128xf32>
    %27 = vector.extract_strided_slice %26 {offsets = [0, 0], sizes = [16, 16], strides = [1, 1]} : vector<16x128xf32> to vector<16x16xf32>
    %28 = vector.extract_strided_slice %26 {offsets = [0, 64], sizes = [16, 16], strides = [1, 1]} : vector<16x128xf32> to vector<16x16xf32>
    %cst_24 = arith.constant 5.000000e-01 : f32
    %29 = vector.broadcast %cst_24 : f32 to vector<16x16xf32>
    %30 = arith.mulf %29, %28 : vector<16x16xf32>
    %31 = math.exp %30 : vector<16x16xf32>
    %32 = arith.mulf %2, %31 : vector<16x16xf32>
    %33 = arith.addf %27, %32 : vector<16x16xf32>
    %34 = arith.truncf %33 : vector<16x16xf32> to vector<16x16xbf16>
    %c0_25 = arith.constant 0 : index
    %c0_26 = arith.constant 0 : index
    %35 = vector.load %arg11[%c0_25, %c0_26] : memref<16x128xbf16, #tpu.memory_space<vmem>>, vector<16x128xbf16>
    %cst_27 = arith.constant dense<0.000000e+00> : vector<16x128xf32>
    %36 = tpu.matmul %34, %35, %cst_27 {dimension_numbers = #tpu.dot_dimension_numbers<[1], [0], [0], [1], [0, 0, 1, 1], [], []>} : vector<16x16xbf16>, vector<16x128xbf16>, vector<16x128xf32> -> vector<16x128xf32>
    %c0_28 = arith.constant 0 : index
    %c0_29 = arith.constant 0 : index
    %37 = vector.load %arg12[%c0_28, %c0_29] : memref<8x128xbf16, #tpu.memory_space<vmem>>, vector<8x128xbf16>
    %cst_30 = arith.constant dense<0.000000e+00> : vector<16x128xf32>
    %38 = tpu.matmul %1, %37, %cst_30 {dimension_numbers = #tpu.dot_dimension_numbers<[1], [0], [0], [1], [0, 0, 1, 1], [], []>} : vector<16x8xbf16>, vector<8x128xbf16>, vector<16x128xf32> -> vector<16x128xf32>
    %39 = arith.addf %36, %38 : vector<16x128xf32>
    %c0_31 = arith.constant 0 : index
    %c0_32 = arith.constant 0 : index
    %40 = vector.load %arg13[%c0_31, %c0_32] : memref<1x128xf32, #tpu.memory_space<vmem>>, vector<1x128xf32>
    %41 = vector.broadcast %40 : vector<1x128xf32> to vector<16x128xf32>
    %42 = arith.addf %39, %41 : vector<16x128xf32>
    %cst_33 = arith.constant 0.000000e+00 : f32
    %43 = vector.broadcast %cst_33 : f32 to vector<16x128xf32>
    %44 = arith.maximumf %42, %43 : vector<16x128xf32>
    %45 = arith.truncf %44 : vector<16x128xf32> to vector<16x128xbf16>
    %c0_34 = arith.constant 0 : index
    %c0_35 = arith.constant 0 : index
    %46 = vector.load %arg14[%c0_34, %c0_35] : memref<128x128xbf16, #tpu.memory_space<vmem>>, vector<128x128xbf16>
    %cst_36 = arith.constant dense<0.000000e+00> : vector<16x128xf32>
    %47 = tpu.matmul %45, %46, %cst_36 {dimension_numbers = #tpu.dot_dimension_numbers<[1], [0], [0], [1], [0, 0, 1, 1], [], []>} : vector<16x128xbf16>, vector<128x128xbf16>, vector<16x128xf32> -> vector<16x128xf32>
    %c0_37 = arith.constant 0 : index
    %c0_38 = arith.constant 0 : index
    %48 = vector.load %arg15[%c0_37, %c0_38] : memref<1x128xf32, #tpu.memory_space<vmem>>, vector<1x128xf32>
    %49 = vector.broadcast %48 : vector<1x128xf32> to vector<16x128xf32>
    %50 = arith.addf %47, %49 : vector<16x128xf32>
    %cst_39 = arith.constant 0.000000e+00 : f32
    %51 = vector.broadcast %cst_39 : f32 to vector<16x128xf32>
    %52 = arith.maximumf %50, %51 : vector<16x128xf32>
    %53 = arith.truncf %52 : vector<16x128xf32> to vector<16x128xbf16>
    %c0_40 = arith.constant 0 : index
    %c0_41 = arith.constant 0 : index
    %54 = vector.load %arg16[%c0_40, %c0_41] : memref<128x64xbf16, #tpu.memory_space<vmem>>, vector<128x64xbf16>
    %cst_42 = arith.constant dense<0.000000e+00> : vector<16x64xf32>
    %55 = tpu.matmul %53, %54, %cst_42 {dimension_numbers = #tpu.dot_dimension_numbers<[1], [0], [0], [1], [0, 0, 1, 1], [], []>} : vector<16x128xbf16>, vector<128x64xbf16>, vector<16x64xf32> -> vector<16x64xf32>
    %c0_43 = arith.constant 0 : index
    %c0_44 = arith.constant 0 : index
    %56 = vector.load %arg17[%c0_43, %c0_44] : memref<1x64xf32, #tpu.memory_space<vmem>>, vector<1x64xf32>
    %57 = vector.broadcast %56 : vector<1x64xf32> to vector<16x64xf32>
    %58 = arith.addf %55, %57 : vector<16x64xf32>
    %59 = arith.negf %58 : vector<16x64xf32>
    %60 = math.exp %59 : vector<16x64xf32>
    %cst_45 = arith.constant 1.000000e+00 : f32
    %61 = vector.broadcast %cst_45 : f32 to vector<16x64xf32>
    %62 = arith.addf %61, %60 : vector<16x64xf32>
    %63 = arith.divf %61, %62 : vector<16x64xf32>
    %c0_46 = arith.constant 0 : index
    %c0_47 = arith.constant 0 : index
    %64 = vector.load %arg18[%c0_46, %c0_47] : memref<16x64xf32, #tpu.memory_space<vmem>>, vector<16x64xf32>
    tpu.vector_store %arg18[%c0_46, %c0_47], %63 {strides = array<i32>} : memref<16x64xf32, #tpu.memory_space<vmem>>, vector<16x64xf32>,
    %c0_48 = arith.constant 0 : index
    %c0_49 = arith.constant 0 : index
    %65 = vector.load %arg19[%c0_48, %c0_49] : memref<16x128xf32, #tpu.memory_space<vmem>>, vector<16x128xf32>
    tpu.vector_store %arg19[%c0_48, %c0_49], %26 {strides = array<i32>} : memref<16x128xf32, #tpu.memory_space<vmem>>, vector<16x128xf32>,
    return
  }
  func.func @transform_0(%arg0: i32) -> (i32, i32) {
    %c0_i32 = arith.constant 0 : i32
    %c0_i32_0 = arith.constant 0 : i32
    return %arg0, %c0_i32 : i32, i32
  }
  func.func @transform_1(%arg0: i32) -> (i32, i32) {
    %c0_i32 = arith.constant 0 : i32
    %c0_i32_0 = arith.constant 0 : i32
    return %arg0, %c0_i32 : i32, i32
  }
  func.func @transform_2(%arg0: i32) -> (i32, i32) {
    %c0_i32 = arith.constant 0 : i32
    %c0_i32_0 = arith.constant 0 : i32
    return %arg0, %c0_i32 : i32, i32
  }
  func.func @transform_3(%arg0: i32) -> (i32, i32) {
    %c0_i32 = arith.constant 0 : i32
    %c0_i32_0 = arith.constant 0 : i32
    %c0_i32_1 = arith.constant 0 : i32
    return %c0_i32, %c0_i32_0 : i32, i32
  }
  func.func @transform_4(%arg0: i32) -> (i32, i32) {
    %c0_i32 = arith.constant 0 : i32
    %c0_i32_0 = arith.constant 0 : i32
    %c0_i32_1 = arith.constant 0 : i32
    return %c0_i32, %c0_i32_0 : i32, i32
  }
  func.func @transform_5(%arg0: i32) -> (i32, i32) {
    %c0_i32 = arith.constant 0 : i32
    %c0_i32_0 = arith.constant 0 : i32
    %c0_i32_1 = arith.constant 0 : i32
    return %c0_i32, %c0_i32_0 : i32, i32
  }
  func.func @transform_6(%arg0: i32) -> (i32, i32) {
    %c0_i32 = arith.constant 0 : i32
    %c0_i32_0 = arith.constant 0 : i32
    %c0_i32_1 = arith.constant 0 : i32
    return %c0_i32, %c0_i32_0 : i32, i32
  }
  func.func @transform_7(%arg0: i32) -> (i32, i32) {
    %c0_i32 = arith.constant 0 : i32
    %c0_i32_0 = arith.constant 0 : i32
    %c0_i32_1 = arith.constant 0 : i32
    return %c0_i32, %c0_i32_0 : i32, i32
  }
  func.func @transform_8(%arg0: i32) -> (i32, i32) {
    %c0_i32 = arith.constant 0 : i32
    %c0_i32_0 = arith.constant 0 : i32
    %c0_i32_1 = arith.constant 0 : i32
    return %c0_i32, %c0_i32_0 : i32, i32
  }
  func.func @transform_9(%arg0: i32) -> (i32, i32) {
    %c0_i32 = arith.constant 0 : i32
    %c0_i32_0 = arith.constant 0 : i32
    %c0_i32_1 = arith.constant 0 : i32
    return %c0_i32, %c0_i32_0 : i32, i32
  }
  func.func @transform_10(%arg0: i32) -> (i32, i32) {
    %c0_i32 = arith.constant 0 : i32
    %c0_i32_0 = arith.constant 0 : i32
    %c0_i32_1 = arith.constant 0 : i32
    return %c0_i32, %c0_i32_0 : i32, i32
  }
  func.func @transform_11(%arg0: i32) -> (i32, i32) {
    %c0_i32 = arith.constant 0 : i32
    %c0_i32_0 = arith.constant 0 : i32
    %c0_i32_1 = arith.constant 0 : i32
    return %c0_i32, %c0_i32_0 : i32, i32
  }
  func.func @transform_12(%arg0: i32) -> (i32, i32) {
    %c0_i32 = arith.constant 0 : i32
    %c0_i32_0 = arith.constant 0 : i32
    %c0_i32_1 = arith.constant 0 : i32
    return %c0_i32, %c0_i32_0 : i32, i32
  }
  func.func @transform_13(%arg0: i32) -> (i32, i32) {
    %c0_i32 = arith.constant 0 : i32
    %c0_i32_0 = arith.constant 0 : i32
    %c0_i32_1 = arith.constant 0 : i32
    return %c0_i32, %c0_i32_0 : i32, i32
  }
  func.func @transform_14(%arg0: i32) -> (i32, i32) {
    %c0_i32 = arith.constant 0 : i32
    %c0_i32_0 = arith.constant 0 : i32
    %c0_i32_1 = arith.constant 0 : i32
    return %c0_i32, %c0_i32_0 : i32, i32
  }
  func.func @transform_15(%arg0: i32) -> (i32, i32) {
    %c0_i32 = arith.constant 0 : i32
    %c0_i32_0 = arith.constant 0 : i32
    %c0_i32_1 = arith.constant 0 : i32
    return %c0_i32, %c0_i32_0 : i32, i32
  }
  func.func @transform_16(%arg0: i32) -> (i32, i32) {
    %c0_i32 = arith.constant 0 : i32
    %c0_i32_0 = arith.constant 0 : i32
    %c0_i32_1 = arith.constant 0 : i32
    return %c0_i32, %c0_i32_0 : i32, i32
  }
  func.func @transform_17(%arg0: i32) -> (i32, i32) {
    %c0_i32 = arith.constant 0 : i32
    %c0_i32_0 = arith.constant 0 : i32
    return %arg0, %c0_i32 : i32, i32
  }
  func.func @transform_18(%arg0: i32) -> (i32, i32) {
    %c0_i32 = arith.constant 0 : i32
    %c0_i32_0 = arith.constant 0 : i32
    return %arg0, %c0_i32 : i32, i32
  }
}

</mosaic_0001>

<bundles_post_ra>
// kernel: cvae_forward.1
= control target key start
LH: loop header
LB: loop body
LE: loop exit
PB: predicated region body
PF: predicated region fallthrough
CT: control target
= control target key end

     0   :  { %s2878_s0 = inlined_call_operand.vmem [shape: bf16[32,64], index: 0, kind: input, shape index: {}]   ;;  %s2879_s1 = inlined_call_operand.vmem [shape: bf16[32,8], index: 1, kind: input, shape index: {}]   ;;  %s2880_s2 = inlined_call_operand.vmem [shape: f32[32,16], index: 2, kind: input, shape index: {}]   ;;  %s2881_s3 = inlined_call_operand.vmem [shape: bf16[64,128], index: 3, kind: input, shape index: {}]   ;;  %s2882_s4 = inlined_call_operand.hbm [shape: bf16[8,128], index: 4, kind: input, shape index: {}]   ;;  %s2883_s5 = inlined_call_operand.vmem [shape: f32[1,128], index: 5, kind: input, shape index: {}]   ;;  %s2884_s6 = inlined_call_operand.vmem [shape: bf16[128,128], index: 6, kind: input, shape index: {}]   ;;  %s2885_s7 = inlined_call_operand.hbm [shape: f32[1,128], index: 7, kind: input, shape index: {}]   ;;  %s2886_s8 = inlined_call_operand.vmem [shape: bf16[128,128], index: 8, kind: input, shape index: {}]   ;;  %s2887_s9 = inlined_call_operand.hbm [shape: f32[1,128], index: 9, kind: input, shape index: {}]   ;;  %s2888_s10 = inlined_call_operand.vmem [shape: bf16[16,128], index: 10, kind: input, shape index: {}]   ;;  %s2889_s11 = inlined_call_operand.vmem [shape: bf16[8,128], index: 11, kind: input, shape index: {}]   ;;  %s2890_s12 = inlined_call_operand.hbm [shape: f32[1,128], index: 12, kind: input, shape index: {}]   ;;  %s2891_s13 = inlined_call_operand.vmem [shape: bf16[128,128], index: 13, kind: input, shape index: {}]   ;;  %s2892_s14 = inlined_call_operand.hbm [shape: f32[1,128], index: 14, kind: input, shape index: {}]   ;;  %s2893_s15 = inlined_call_operand.vmem [shape: bf16[128,64], index: 15, kind: input, shape index: {}]   ;;  %s2894_s16 = inlined_call_operand.hbm [shape: f32[1,64], index: 16, kind: input, shape index: {}]   ;;  %s2895_s17 = inlined_call_operand.hbm [shape: f32[32,64], index: 17, kind: output, shape index: {0}]   ;;  %s2896_s18 = inlined_call_operand.vmem [shape: f32[32,128], index: 18, kind: output, shape index: {1}]  }
   0x1   :  { %2910 = sst [smem:[#allocation27_spill]] %s2878_s0 }
   0x2   :  { %2911 = sst [smem:[#allocation28_spill]] %s2879_s1 }
   0x3   :  { %2912 = sst [smem:[#allocation29_spill]] %s2880_s2 }
   0x4   :  { %2913 = sst [smem:[#allocation30_spill]] %s2885_s7 }
   0x5   :  { %2914 = sst [smem:[#allocation31_spill]] %s2895_s17 }
   0x6   :  { %24 = vsyncpa [#allocation3], 0 }
   0x7   :  { %25 = vsyncpa [#allocation6], 0 }
   0x8   :  { %26 = vsyncpa [#allocation9], 0 }
   0x9   :  { %27 = vsyncpa [#allocation12], 0 }
   0xa   :  { %28 = vsyncpa [#allocation4], 0 }
   0xb   :  { %30 = vsyncpa [#allocation4 + $0x1], 0  ;;  %s2410_s27 = smov 0   ;;  %s2412_s28 = smov 0  }
   0xc   :  { %s2414_s29 = smov 0   ;;  %s2416_s30 = smov 0  }
   0xd LB: > { %2915 = sst [smem:[#allocation19_spill]] %s2289_s27  ;;  %s2431_s0 = sadd.s32 4294967295, %s2301_s30   ;;  %s2301_s30 = sphi %s2416_s30, %s2950_s30   ;;  %s2297_s29 = sphi %s2414_s29, %s2953_s29   ;;  %s2293_s28 = sphi %s2412_s28, %s2952_s28   ;;  %s2289_s27 = sphi %s2410_s27, %s2951_s27  }
   0xe   : > { %2916 = sst [smem:[#allocation20_spill]] %s2293_s28  ;;  %s1660_s19 = sadd.s32 4294967294, %s2301_s30  }
   0xf   : > { %2917 = sst [smem:[#allocation21_spill]] %s2297_s29  ;;  %s2435_s1 = sadd.s32 1, %s2301_s30  }
  0x10   : > { %2918 = sst [smem:[#allocation22_spill]] %s2301_s30  ;;  %s415_s20 = sadd.s32 1, %s2297_s29 }
  0x11   : > { %2919 = sst [smem:[#allocation23_spill]] %s2435_s1  ;;  %s412_s21 = ssub.s32 %s2301_s30, %s2435_s1 }
  0x12   : > { %p425_p0 = scmp.ne.s32.totalorder %s2297_s29, %s2293_s28  ;;  %p413_p1 = scmp.eq.s32.totalorder %s412_s21, 0 }
  0x13   : > { %p426_p2 = scmp.eq.s32.totalorder %s2431_s0, 1  ;;  %p431_p3 = scmp.ne.s32.totalorder %s2293_s28, %s2289_s27 }
  0x14   : > { %p432_p4 = scmp.eq.s32.totalorder %s1660_s19, 1  ;;  %p1661_p7 = scmp.ge.s32.totalorder %s2301_s30, 1 }
  0x15   : > { %s2446_s22 = scalar_select %p413_p1, %s2297_s29, %s415_s20  }
  0x16   : > { %p2448_p5 = por %p426_p2, %p425_p0  ;;  %p2452_p6 = por %p432_p4, %p431_p3 }
  0x17   : > { %2920 = sst [smem:[#allocation24_spill]] %s2446_s22  ;;  %p465_p8 = scmp.lt.s32.totalorder %s2301_s30, 3 }
  0x18   : > { %s2921_s2 = scalar_select %p2448_p5, 1, 0 }
  0x19   : > { %s2923_s23 = scalar_select %p2452_p6, 1, 0 }
  0x1a   : > { %2922 = sst [smem:[#allocation25_spill]] %s2921_s2  ;;  %p2904_p9 = scmp.eq.s32.totalorder %s2431_s0, 0 }
  0x1b   : > { %2924 = sst [smem:[#allocation26_spill]] %s2923_s23  ;;  %p2459_p10 = pnand %p1661_p7, %p465_p8 }
  0x1c   : > { %s2303_s25 = smov [#allocation5]   ;;  %s2304_s19 = smov [#allocation8]  }
  0x1d   : > { %s2925_s24 = scalar_select %p2459_p10, 1, 0 }
  0x1e   : > { %s498_s26 = sshll.u32 %s2303_s25, 4  ;;  %p1925_p11 = pneg %p2459_p10  ;;  %s499_s26 = int_to_ptr.vmem [resolvable:$true] %s498_s26 }
  0x1f   : > { %s529_s20 = sshll.u32 %s2304_s19, 4  ;;  %s2305_s22 = smov [#allocation2]   ;;  %s2471_s20 = int_to_ptr.vmem [resolvable:$true] %s529_s20 }
  0x20   : > { %p2467_p12 = pnand %p2904_p9, %p1925_p11  ;;  %s481_s29 = sshll.u32 %s2305_s22, 4  ;;  %s2473_s29 = int_to_ptr.vmem [resolvable:$true] %s481_s29 }
  0x21   : > { %s2927_s7 = sld [smem:[#allocation30_spill]] }
  0x22   : > { %p2483_p0 = pneg %p2467_p12 }
  0x27   : > { %s2055_s25 = scalar_lea.hbm %s2927_s7, 16 }
  0x28   : > { %p2056_p13 = scmp.ne.s32.totalorder %s2927_s7, %s2055_s25  ;;  %p2062_p3 = scmp.lt.u32.totalorder %s2055_s25, %s2927_s7 }
  0x2a   : > { %p2058_p1 = pnand %p2483_p0, %p2056_p13 }
  0x2c   : > { %p2059_p2 = pneg %p2058_p1 }
  0x2e   : > { %p2064_p4 = pnand %p2062_p3, %p2059_p2 }
  0x30   : > { %2067 = shalt.err (!%p2064_p4)
}
  0x31   : > { %s2068_s1 = scalar_lea.vmem %s499_s26, 16  ;;  %s2075_s27 = scalar_lea.vmem %s499_s26, 32 }
  0x32   : > { %p2069_p7 = scmp.ne.s32.totalorder %s499_s26, %s2068_s1  ;;  %p2076_p9 = scmp.lt.s32.totalorder %s499_s26, %s499_s26 }
  0x33   : > { %p2077_p6 = scmp.lt.s32.totalorder %s2075_s27, %s2068_s1 }
  0x34   : > { %p2071_p8 = pnand %p2069_p7, %p2483_p0 }
  0x35   : > { %p2078_p5 = por %p2077_p6, %p2076_p9 }
  0x36   : > { %p2072_p11 = pneg %p2071_p8 }
  0x38   : > { %p2079_p10 = pnand %p2078_p5, %p2072_p11 }
  0x3a   : > { %2082 = shalt.err (!%p2079_p10)
}
  0x3b   : > { %1931 = dma.hbm_to_vmem [thread:$0]  (!%p2467_p12), %s2927_s7, 16, %s499_s26, [#allocation6]  }
  0x3c   : > { %s2083_s22 = scalar_lea.hbm %s2890_s12, 16 }
  0x3d   : > { %p2084_p13 = scmp.ne.s32.totalorder %s2890_s12, %s2083_s22  ;;  %p2090_p5 = scmp.lt.u32.totalorder %s2083_s22, %s2890_s12 }
  0x3f   : > { %p2086_p1 = pnand %p2084_p13, %p2483_p0 }
  0x41   : > { %p2087_p6 = pneg %p2086_p1 }
  0x43   : > { %p2092_p9 = pnand %p2090_p5, %p2087_p6 }
  0x45   : > { %2095 = shalt.err (!%p2092_p9)
}
  0x46   : > { %s2096_s26 = scalar_lea.vmem %s2471_s20, 16  ;;  %s2103_s28 = scalar_lea.vmem %s2471_s20, 32 }
  0x47   : > { %p2097_p10 = scmp.ne.s32.totalorder %s2471_s20, %s2096_s26  ;;  %p2104_p4 = scmp.lt.s32.totalorder %s2471_s20, %s2471_s20 }
  0x48   : > { %p2105_p7 = scmp.lt.s32.totalorder %s2103_s28, %s2096_s26 }
  0x49   : > { %p2099_p2 = pnand %p2097_p10, %p2483_p0 }
  0x4a   : > { %p2106_p8 = por %p2105_p7, %p2104_p4 }
  0x4b   : > { %p2100_p3 = pneg %p2099_p2 }
  0x4d   : > { %p2107_p11 = pnand %p2106_p8, %p2100_p3 }
  0x4f   : > { %2110 = shalt.err (!%p2107_p11)
}
  0x50   : > { %1937 = dma.hbm_to_vmem [thread:$0]  (!%p2467_p12), %s2890_s12, 16, %s2471_s20, [#allocation9]  }
  0x51   : > { %s2111_s25 = scalar_lea.hbm %s2882_s4, 64 }
  0x52   : > { %p2112_p13 = scmp.ne.s32.totalorder %s2882_s4, %s2111_s25  ;;  %p2118_p5 = scmp.lt.u32.totalorder %s2111_s25, %s2882_s4 }
  0x54   : > { %p2114_p1 = pnand %p2112_p13, %p2483_p0 }
  0x56   : > { %p2115_p6 = pneg %p2114_p1 }
  0x58   : > { %p2120_p9 = pnand %p2118_p5, %p2115_p6 }
  0x5a   : > { %2123 = shalt.err (!%p2120_p9)
}
  0x5b   : > { %s2124_s20 = scalar_lea.vmem %s2473_s29, 64  ;;  %p2132_p4 = scmp.lt.s32.totalorder %s2473_s29, %s2473_s29 }
  0x5c   : > { %p2125_p10 = scmp.ne.s32.totalorder %s2473_s29, %s2124_s20  ;;  %p2133_p7 = scmp.lt.s32.totalorder %s2124_s20, %s2124_s20 }
  0x5e   : > { %p2127_p2 = pnand %p2125_p10, %p2483_p0  ;;  %p2134_p8 = por %p2133_p7, %p2132_p4 }
  0x60   : > { %p2128_p3 = pneg %p2127_p2 }
  0x62   : > { %p2135_p11 = pnand %p2134_p8, %p2128_p3 }
  0x64   : > { %2138 = shalt.err (!%p2135_p11)
}
  0x65   : > { %1928 = dma.hbm_to_vmem [thread:$0]  (!%p2467_p12), %s2882_s4, 64, %s2473_s29, [#allocation3]  }
  0x66   : > { %s2306_s30 = smov [#allocation7]   ;;  %s2307_s17 = smov [#allocation10]  }
  0x67   : > { %s512_s23 = sshll.u32 %s2306_s30, 4  ;;  %s543_s25 = sshll.u32 %s2307_s17, 4  ;;  %s513_s23 = int_to_ptr.vmem [resolvable:$true] %s512_s23  ;;  %s544_s25 = int_to_ptr.vmem [resolvable:$true] %s543_s25 }
  0x68   : > { %s2139_s27 = scalar_lea.hbm %s2887_s9, 16 }
  0x69   : > { %p2140_p13 = scmp.ne.s32.totalorder %s2887_s9, %s2139_s27  ;;  %p2146_p5 = scmp.lt.u32.totalorder %s2139_s27, %s2887_s9 }
  0x6b   : > { %p2142_p1 = pnand %p2140_p13, %p2483_p0 }
  0x6d   : > { %p2143_p6 = pneg %p2142_p1 }
  0x6f   : > { %p2148_p9 = pnand %p2146_p5, %p2143_p6 }
  0x71   : > { %2151 = shalt.err (!%p2148_p9)
}
  0x72   : > { %s2152_s29 = scalar_lea.vmem %s513_s23, 16  ;;  %s2159_s2 = scalar_lea.vmem %s513_s23, 32 }
  0x73   : > { %p2153_p10 = scmp.ne.s32.totalorder %s513_s23, %s2152_s29  ;;  %p2160_p4 = scmp.lt.s32.totalorder %s513_s23, %s513_s23 }
  0x74   : > { %p2161_p7 = scmp.lt.s32.totalorder %s2159_s2, %s2152_s29 }
  0x75   : > { %p2155_p2 = pnand %p2153_p10, %p2483_p0 }
  0x76   : > { %p2162_p8 = por %p2161_p7, %p2160_p4 }
  0x77   : > { %p2156_p3 = pneg %p2155_p2 }
  0x79   : > { %p2163_p11 = pnand %p2162_p8, %p2156_p3 }
  0x7b   : > { %2166 = shalt.err (!%p2163_p11)
}
  0x7c   : > { %1934 = dma.hbm_to_vmem [thread:$0]  (!%p2467_p12), %s2887_s9, 16, %s513_s23, [#allocation6]  }
  0x7d   : > { %s2167_s1 = scalar_lea.hbm %s2892_s14, 16 }
  0x7e   : > { %p2168_p13 = scmp.ne.s32.totalorder %s2892_s14, %s2167_s1  ;;  %p2174_p5 = scmp.lt.u32.totalorder %s2167_s1, %s2892_s14 }
  0x80   : > { %p2170_p1 = pnand %p2168_p13, %p2483_p0 }
  0x82   : > { %p2171_p6 = pneg %p2170_p1 }
  0x84   : > { %p2176_p9 = pnand %p2174_p5, %p2171_p6 }
  0x86   : > { %2179 = shalt.err (!%p2176_p9)
}
  0x87   : > { %s2180_s29 = scalar_lea.vmem %s544_s25, 16  ;;  %s2187_s23 = scalar_lea.vmem %s544_s25, 32 }
  0x88   : > { %p2181_p10 = scmp.ne.s32.totalorder %s544_s25, %s2180_s29  ;;  %p2188_p4 = scmp.lt.s32.totalorder %s544_s25, %s544_s25 }
  0x89   : > { %p2189_p7 = scmp.lt.s32.totalorder %s2187_s23, %s2180_s29 }
  0x8a   : > { %p2183_p2 = pnand %p2181_p10, %p2483_p0 }
  0x8b   : > { %p2190_p8 = por %p2189_p7, %p2188_p4 }
  0x8c   : > { %p2184_p3 = pneg %p2183_p2 }
  0x8e   : > { %p2191_p11 = pnand %p2190_p8, %p2184_p3 }
  0x90   : > { %2194 = shalt.err (!%p2191_p11)
}
  0x91   : > { %1940 = dma.hbm_to_vmem [thread:$0]  (!%p2467_p12), %s2892_s14, 16, %s544_s25, [#allocation9]  }
  0x92   : > { %s2308_s17 = smov [#allocation11]   ;;  %s2195_s27 = scalar_lea.hbm %s2894_s16, 16 }
  0x93   : > { %s557_s7 = sshll.u32 %s2308_s17, 4  ;;  %p2196_p13 = scmp.ne.s32.totalorder %s2894_s16, %s2195_s27  ;;  %s558_s7 = int_to_ptr.vmem [resolvable:$true] %s557_s7 }
  0x94   : > { %p2202_p5 = scmp.lt.u32.totalorder %s2195_s27, %s2894_s16 }
  0x95   : > { %p2198_p1 = pnand %p2196_p13, %p2483_p0 }
  0x97   : > { %p2199_p6 = pneg %p2198_p1 }
  0x99   : > { %p2204_p9 = pnand %p2202_p5, %p2199_p6 }
  0x9b   : > { %2207 = shalt.err (!%p2204_p9)
}
  0x9c   : > { %s2208_s25 = scalar_lea.vmem %s558_s7, 16  ;;  %s2215_s23 = scalar_lea.vmem %s558_s7, 32 }
  0x9d   : > { %p2209_p10 = scmp.ne.s32.totalorder %s558_s7, %s2208_s25  ;;  %p2216_p4 = scmp.lt.s32.totalorder %s558_s7, %s558_s7 }
  0x9e   : > { %p2217_p7 = scmp.lt.s32.totalorder %s2215_s23, %s2208_s25 }
  0x9f   : > { %p2211_p2 = pnand %p2209_p10, %p2483_p0 }
  0xa0   : > { %p2218_p8 = por %p2217_p7, %p2216_p4 }
  0xa1   : > { %p2212_p3 = pneg %p2211_p2 }
  0xa3   : > { %p2219_p11 = pnand %p2218_p8, %p2212_p3 }
  0xa5   : > { %2222 = shalt.err (!%p2219_p11)
}
  0xa6   : > { %1943 = dma.hbm_to_vmem [thread:$0]  (!%p2467_p12), %s2894_s16, 16, %s558_s7, [#allocation12]  }
  0xa7   : > { %p2929_p13 = scmp.ne.s32.totalorder %s2925_s24, 0 }
  0xa8   : > { %p2930_p1 = scmp.eq.s32.totalorder (!%p2929_p13), %s2431_s0, 0 }
  0xa9   : > { %597 = sbr.rel (%p2929_p13) target bundleno = 1700 (0x6a4), region = 88 }
  0xb0   : > { %2268 = dma.done.wait (%p2930_p1), [#allocation3], 64   ;;  %p2931_p0 = pmov %p2930_p1 }
  0xb2   : > { %2270 = vsyncadd (%p2931_p0), [#allocation3], 4294967232  ;;  %p2932_p6 = pmov %p2931_p0 }
  0xb3   : > { %p2933_p5 = pmov %p2931_p0 }
  0xb4   : > { %2272 = dma.done.wait (%p2932_p6), [#allocation6], 32  }
  0xb5   : > { %2274 = vsyncadd (%p2933_p5), [#allocation6], 4294967264  ;;  %p2934_p9 = pmov %p2931_p0 }
  0xb6   : > { %p2935_p12 = pmov %p2931_p0 }
  0xb7   : > { %2276 = dma.done.wait (%p2934_p9), [#allocation9], 32  }
  0xb8   : > { %2278 = vsyncadd (%p2935_p12), [#allocation9], 4294967264  ;;  %p2936_p10 = pmov %p2931_p0 }
  0xb9   : > { %p2937_p2 = pmov %p2931_p0 }
  0xba   : > { %2280 = dma.done.wait (%p2936_p10), [#allocation12], 16  }
  0xbb   : > { %2282 = vsyncadd (%p2937_p2), [#allocation12], 4294967280  ;;  %s1677_s24 = sshll.u32 %s2431_s0, 1  ;;  %v2309_v0 = vmov 0.0   ;;  %vm2310_vm0 = vmmov 0   ;;  %v2004_v1 = vld [vmem:[%s2881_s3] sm:$0xff]  }
  0xbc   : > { %1795 = vmatprep.subr.bf16.mxu1 %v2309_v0  ;;  %1789 = vmatprep.subr.bf16.mxu0 %v2309_v0  ;;  %p687_p3 = scmp.lt.s32.totalorder %s1677_s24, 3  ;;  %vm736_vm1 = vcmask 1043456   ;;  %s2938_s1 = sld [smem:[#allocation28_spill]]  ;;  %v2005_v2 = vld [vmem:[%s2881_s3 + $0x8] sm:$0xff]   ;;  %v726_v3 = vld [vmem:[#allocation2] sm:$0xf] }
  0xbd   : > { %1791 = vmatprep.mubr.msk.bf16.mxu0 %vm2310_vm0, %v2309_v0  ;;  %1803 = vmatprep.mubr.msk.bf16.mxu1 %vm2310_vm0, %v2309_v0  ;;  %v738_v4 = vsel %vm736_vm1, %v726_v3, 0  ;;  %vm732_vm2 = vcmask 64512   ;;  %s2939_s25 = sld [smem:[#allocation27_spill]]  ;;  %v2006_v6 = vld [vmem:[%s2881_s3 + $0x10] sm:$0xff]   ;;  %v2010_v7 = vld [vmem:[%s2884_s6] sm:$0xff]   ;;  %v2011_v8 = vld [vmem:[%s2884_s6 + $0x8] sm:$0xff]  }
  0xbe   : > { %s2955_s24 = smov (!%p687_p3, %s1677_s24), 3  ;;  %1796 = vmatpush3.bf16.msra.mxu1 %v2004_v1  ;;  %1790 = vmatpush3.bf16.msra.mxu0 %v738_v4  ;;  %v2008_v9 = vld [vmem:[%s2881_s3 + $0x18] sm:$0xff]   ;;  %vm810_vm3 = vcmask 523264   ;;  %v2012_v11 = vld [vmem:[%s2884_s6 + $0x10] sm:$0xff]   ;;  %v2014_v13 = vld [vmem:[%s2884_s6 + $0x20] sm:$0xff]   ;;  %s2940_s2 = sld [smem:[#allocation29_spill]] }
  0xbf   : > { %s1678_s21 = sshll.u32 %s2955_s24, 2  ;;  %1797 = vmatprep.subr.bf16.mxu1 %v2309_v0  ;;  %1807 = vmatprep.subr.bf16.mxu0 %v2309_v0  ;;  %v2013_v12 = vld [vmem:[%s2884_s6 + $0x18] sm:$0xff]   ;;  %v2015_v14 = vld [vmem:[%s2884_s6 + $0x28] sm:$0xff]   ;;  %v2016_v15 = vld [vmem:[%s2884_s6 + $0x30] sm:$0xff]   ;;  %s1682_s20 = sshll.u32 %s2955_s24, 3  ;;  %vm1166_vm4 = vcmask 130048  }
  0xc0   : > { %v2017_v16 = vld [vmem:[%s2884_s6 + $0x38] sm:$0xff]   ;;  %v2018_v17 = vld [vmem:[%s2886_s8] sm:$0xff]   ;;  %v2019_v18 = vld [vmem:[%s2886_s8 + $0x8] sm:$0xff]   ;;  %s2941_s22 = sld [smem:[#allocation20_spill]]  ;;  %s1741_s28 = sshll.u32 %s2431_s0, 8 }
  0xc1   : > { %v2020_v19 = vld [vmem:[%s2886_s8 + $0x10] sm:$0xff]   ;;  %v2021_v20 = vld [vmem:[%s2886_s8 + $0x18] sm:$0xff]   ;;  %v2022_v21 = vld [vmem:[%s2886_s8 + $0x20] sm:$0xff]   ;;  %s2312_s17 = smov [#allocation13]  }
  0xc2   : > { %s696_s27 = scalar_lea.vmem %s2938_s1, %s1678_s21  ;;  %1798 = vmatpush3.bf16.msra.mxu1 %v2005_v2  ;;  %v2023_v22 = vld [vmem:[%s2886_s8 + $0x28] sm:$0xff]   ;;  %v1693_v28 = vld [vmem:[%s2883_s5] ss:$0 sm:$0xff]  ;;  %v2024_v41 = vld [vmem:[%s2886_s8 + $0x30] sm:$0xff]   ;;  %s2227_s7 = sshll.u32 %s2312_s17, 4  ;;  %s2228_s7 = int_to_ptr.vmem [resolvable:$false] %s2227_s7 }
  0xc3   : > { %v2639_v5 = vld [vmem:[%s696_s27] sm:$0xff]   ;;  %s690_s23 = scalar_lea.vmem %s2939_s25, %s1678_s21  ;;  %1799 = vmatprep.subr.bf16.mxu1 %v2309_v0  ;;  %v2025_v42 = vld [vmem:[%s2886_s8 + $0x38] sm:$0xff]   ;;  %s709_s25 = scalar_lea.vmem %s2896_s18, %s1682_s20 }
  0xc4   : > { %1792 = vmatmul.mubr.msk.bf16.vlgmr.msra.gmra.mrb[0].mxu0 %vm732_vm2, %v2639_v5  ;;  %v2009_v10 = vld [vmem:[%s690_s23] sm:$0xff]   ;;  %s2311_s21 = smov 64   ;;  %s702_s30 = scalar_lea.vmem %s2940_s2, %s1682_s20 }
  0xc5   : > { %1808 = vmatpush3.bf16.msra.mxu0 %v2010_v7  ;;  %1823 = vmatprep.mubr.msk.bf16.mxu0 %vm2310_vm0, %v2309_v0  ;;  %v1115_v36 = vld [vmem:[%s2889_s11] sm:$0xf]  ;;  %v1694_v43 = vld [vmem:[#allocation5] ss:$0 sm:$0xff]  ;;  %v1703_v53 = vld [vmem:[#allocation7] ss:$0 sm:$0xff] }
  0xc6   : > { %1800 = vmatpush3.bf16.msra.mxu1 %v2006_v6  ;;  %1809 = vmatprep.subr.bf16.mxu0 %v2309_v0  ;;  %v1117_v39 = vsel %vm736_vm1, %v1115_v36, 0  ;;  %v2026_v1 = vld [vmem:[%s2888_s10] sm:$0xff]   ;;  %v2028_v6 = vld [vmem:[%s2891_s13 + $0x8] sm:$0xff]   ;;  %s676_s1 = sand.u32 1, %s2941_s22   ;;  %s2942_s27 = sld [smem:[#allocation25_spill]] }
  0xc7   : > { %1801 = vmatprep.subr.bf16.mxu1 %v2309_v0  ;;  %v2027_v2 = vld [vmem:[%s2891_s13] sm:$0xff]   ;;  %s1676_s26 = sshll.u32 %s676_s1, 4  ;;  %s2837_s20 = scalar_lea.sflag [#allocation4], %s676_s1 }
  0xc8   : > { %s678_s29 = scalar_lea.vmem [#allocation13], %s1676_s26 }
  0xc9   : > { %1810 = vmatpush3.bf16.msra.mxu0 %v2011_v8 }
  0xca   : > { %1802 = vmatpush3.bf16.msra.mxu1 %v2008_v9  ;;  %1811 = vmatprep.subr.bf16.mxu0 %v2309_v0 }
  0xcb   : > { %1827 = vmatprep.subr.bf16.mxu1 %v2309_v0 }
  0xcc   : > { %p2945_p7 = scmp.ne.s32.totalorder %s2942_s27, 0 }
  0xcd   : > { %1804 = vmatmul.mubr.msk.bf16.vlgmr.msra.gmra.mrb[0].mxu1 %vm810_vm3, %v2009_v10  ;;  %1812 = vmatpush3.bf16.msra.mxu0 %v2012_v11  ;;  %v2029_v10 = vld [vmem:[%s2891_s13 + $0x10] sm:$0xff]   ;;  %v2030_v11 = vld [vmem:[%s2891_s13 + $0x18] sm:$0xff]  }
  0xce   : > { %1813 = vmatprep.subr.bf16.mxu0 %v2309_v0  ;;  %1843 = vmatprep.mubr.msk.bf16.mxu1 %vm2310_vm0, %v2309_v0 }
  0xcf   : > { %1828 = vmatpush3.bf16.msra.mxu1 %v2018_v17 }
  0xd0   : > { %1829 = vmatprep.subr.bf16.mxu1 %v2309_v0 }
  0xd1   : > { %1814 = vmatpush3.bf16.msra.mxu0 %v2013_v12  ;;  %v2031_v12 = vld [vmem:[%s2891_s13 + $0x20] sm:$0xff]  }
  0xd2   : > { %1815 = vmatprep.subr.bf16.mxu0 %v2309_v0 }
  0xd3   : > { %1830 = vmatpush3.bf16.msra.mxu1 %v2019_v18 }
  0xd4   : > { %1831 = vmatprep.subr.bf16.mxu1 %v2309_v0 }
  0xd5   : > { %1816 = vmatpush3.bf16.msra.mxu0 %v2014_v13  ;;  %v716_v13 = vld [vmem:[%s702_s30] sm:$0xff] }
  0xd6   : > { %1817 = vmatprep.subr.bf16.mxu0 %v2309_v0 }
  0xd7   : > { %1832 = vmatpush3.bf16.msra.mxu1 %v2020_v19 }
  0xd8   : > { %1833 = vmatprep.subr.bf16.mxu1 %v2309_v0 }
  0xd9   : > { %1818 = vmatpush3.bf16.msra.mxu0 %v2015_v14 }
  0xda   : > { %1819 = vmatprep.subr.bf16.mxu0 %v2309_v0 }
  0xdb   : > { %1834 = vmatpush3.bf16.msra.mxu1 %v2021_v20 }
  0xdc   : > { %1835 = vmatprep.subr.bf16.mxu1 %v2309_v0 }
  0xdd   : > { %1820 = vmatpush3.bf16.msra.mxu0 %v2016_v15  ;;  %v717_v15 = vld [vmem:[%s702_s30 + $0x8] sm:$0xff]  ;;  %s2943_s30 = sld [smem:[#allocation31_spill]] }
  0xde   : > { %1821 = vmatprep.subr.bf16.mxu0 %v2309_v0 }
  0xdf   : > { %1836 = vmatpush3.bf16.msra.mxu1 %v2022_v21 }
  0xe0   : > { %1837 = vmatprep.subr.bf16.mxu1 %v2309_v0 }
  0xe1   : > { %1822 = vmatpush3.bf16.msra.mxu0 %v2017_v16 }
  0xe2   : > { %1847 = vmatprep.subr.bf16.mxu0 %v2309_v0 }
  0xe3   : > { %1838 = vmatpush3.bf16.msra.mxu1 %v2023_v22  ;;  %v2032_v22 = vld [vmem:[%s2891_s13 + $0x28] sm:$0xff]   ;;  %s2944_s19 = smov %s2943_s30  ;;  %s2831_s24 = scalar_lea.hbm %s2943_s30, %s1741_s28 }
  0xe4   : > { %1839 = vmatprep.subr.bf16.mxu1 %v2309_v0 }
  0xe7   : > { %1840 = vmatpush3.bf16.msra.mxu1 %v2024_v41 }
  0xe8   : > { %1841 = vmatprep.subr.bf16.mxu1 %v2309_v0 }
  0xeb   : > { %1842 = vmatpush3.bf16.msra.mxu1 %v2025_v42 }
  0xec   : > { %1859 = vmatprep.subr.bf16.mxu1 %v2309_v0 }
 0x197   : > { %v774_v23 = vpop.f32.mrb[0].mxu0 }
 0x198   : > { %v1793_v24 = vpop.f32.mrb[1].mxu0 }
 0x199   : > { %v777_v25 = vpop.f32.mrb[2].mxu0  ;;  %v2034_v24 = vld [vmem:[%s2891_s13 + $0x38] sm:$0xff]  }
 0x19a   : > { %v1794_v26 = vpop.f32.mrb[3].mxu0 }
 0x19b   : > { %v2036_v26 = vld [vmem:[%s2893_s15 + $0x8] sm:$0xff]  }
 0x1a0   : > { %v848_v27 = vpop.f32.mrb[0].mxu1 }
 0x1a1   : > { %v849_v29 = vadd.f32 %v848_v27, %v774_v23  ;;  %v1805_v30 = vpop.f32.mrb[1].mxu1  ;;  %v2033_v23 = vld [vmem:[%s2891_s13 + $0x30] sm:$0xff]  }
 0x1a2   : > { %v851_v31 = vpop.f32.mrb[2].mxu1  ;;  %v2037_v27 = vld [vmem:[%s2893_s15 + $0x10] sm:$0xff]   ;;  %v2040_v30 = vld [vmem:[%s2893_s15 + $0x28] sm:$0xff]  }
 0x1a3   : > { %v862_v32 = vadd.f32 %v1693_v28, %v849_v29  ;;  %v852_v33 = vadd.f32 %v851_v31, %v777_v25  ;;  %v1806_v34 = vpop.f32.mrb[3].mxu1  ;;  %v2035_v25 = vld [vmem:[%s2893_s15] sm:$0xff]  }
 0x1a4   : > { %v2039_v29 = vld [vmem:[%s2893_s15 + $0x20] sm:$0xff]  }
 0x1a5   : > { %v863_v35 = vadd.f32 %v1693_v28, %v852_v33  ;;  %v864_v37 = vmax.f32 %v862_v32, 0.0  ;;  %v2038_v28 = vld [vmem:[%s2893_s15 + $0x18] sm:$0xff]   ;;  %v1715_v32 = vld [vmem:[#allocation8] ss:$0 sm:$0xff] }
 0x1a7   : > { %v865_v38 = vmax.f32 %v863_v35, 0.0 }
 0x1a9   : > { %v866_v40 = vpack.c.bf16 %v865_v38, %v864_v37 }
 0x1ab   : > { %1824 = vmatmul.mubr.bf16.vlgmr.msra.gmra.mrb[4].mxu0 %v866_v40 }
 0x1ac   : > { %1848 = vmatpush3.bf16.msra.mxu0 %v1117_v39  ;;  %1849 = vmatprep.mubr.msk.bf16.mxu0 %vm2310_vm0, %v2309_v0 }
 0x1ad   : > { %1853 = vmatprep.subr.bf16.mxu0 %v2309_v0 }
 0x1b3   : > { %1850 = vmatmul.mubr.msk.bf16.vlgmr.msra.gmra.mrb[8].mxu0 %vm732_vm2, %v2639_v5 }
 0x1b4   : > { %1855 = vmatprep.mubr.msk.bf16.mxu0 %vm2310_vm0, %v2309_v0  ;;  %1854 = vmatpush3.bf16.msra.mxu0 %v2026_v1 }
 0x1b5   : > { %1879 = vmatprep.subr.bf16.mxu0 %v2309_v0 }
 0x27e   : > { %v972_v44 = vpop.f32.mrb[4].mxu0 }
 0x27f   : > { %v973_v45 = vadd.f32 %v1694_v43, %v972_v44  ;;  %v1825_v46 = vpop.f32.mrb[5].mxu0  ;;  %v2042_v44 = vld [vmem:[%s2893_s15 + $0x38] sm:$0xff]  }
 0x280   : > { %v975_v47 = vpop.f32.mrb[6].mxu0 }
 0x281   : > { %v976_v48 = vadd.f32 %v1694_v43, %v975_v47  ;;  %v1826_v49 = vpop.f32.mrb[7].mxu0  ;;  %v979_v50 = vmax.f32 %v973_v45, 0.0  ;;  %v2041_v43 = vld [vmem:[%s2893_s15 + $0x30] sm:$0xff]   ;;  %v1716_v45 = vld [vmem:[#allocation10] ss:$0 sm:$0xff] }
 0x283   : > { %v980_v51 = vmax.f32 %v976_v48, 0.0 }
 0x285   : > { %v981_v52 = vpack.c.bf16 %v980_v51, %v979_v50 }
 0x286   : > { %v2754_v3 = vpop.f32.mrb[8].mxu0 }
 0x287   : > { %1844 = vmatmul.mubr.bf16.vlgmr.msra.gmra.mrb[4].mxu1 %v981_v52  ;;  %v1851_v4 = vpop.f32.mrb[9].mxu0 }
 0x288   : > { %1875 = vmatprep.mubr.msk.bf16.mxu1 %vm2310_vm0, %v2309_v0  ;;  %1860 = vmatpush3.bf16.msra.mxu1 %v2027_v2  ;;  %v2759_v7 = vpop.f32.mrb[10].mxu0 }
 0x289   : > { %1861 = vmatprep.subr.bf16.mxu1 %v2309_v0  ;;  %v1852_v8 = vpop.f32.mrb[11].mxu0 }
 0x28c   : > { %1862 = vmatpush3.bf16.msra.mxu1 %v2028_v6 }
 0x28d   : > { %1863 = vmatprep.subr.bf16.mxu1 %v2309_v0 }
 0x290   : > { %1864 = vmatpush3.bf16.msra.mxu1 %v2029_v10 }
 0x291   : > { %1865 = vmatprep.subr.bf16.mxu1 %v2309_v0 }
 0x294   : > { %1866 = vmatpush3.bf16.msra.mxu1 %v2030_v11 }
 0x295   : > { %1867 = vmatprep.subr.bf16.mxu1 %v2309_v0 }
 0x298   : > { %1868 = vmatpush3.bf16.msra.mxu1 %v2031_v12 }
 0x299   : > { %1869 = vmatprep.subr.bf16.mxu1 %v2309_v0 }
 0x29c   : > { %1870 = vmatpush3.bf16.msra.mxu1 %v2032_v22 }
 0x29d   : > { %1871 = vmatprep.subr.bf16.mxu1 %v2309_v0 }
 0x2a0   : > { %1872 = vmatpush3.bf16.msra.mxu1 %v2033_v23 }
 0x2a1   : > { %1873 = vmatprep.subr.bf16.mxu1 %v2309_v0 }
 0x2a4   : > { %1874 = vmatpush3.bf16.msra.mxu1 %v2034_v24 }
 0x35a   : > { %v1087_v54 = vpop.f32.mrb[4].mxu1 }
 0x35b   : > { %v1088_v55 = vadd.f32 %v1703_v53, %v1087_v54  ;;  %v1845_v56 = vpop.f32.mrb[5].mxu1 }
 0x35c   : > { %v1090_v57 = vpop.f32.mrb[6].mxu1 }
 0x35d   : > { %v1094_v58 = vmul.f32 0.5, %v1088_v55  ;;  %v1091_v59 = vadd.f32 %v1703_v53, %v1090_v57  ;;  %v1846_v60 = vpop.f32.mrb[7].mxu1  ;;  %1464 = vst [vmem:[%s709_s25] sm:$0xff] %v1088_v55 }
 0x35f   : > { %v1096_v61 = vmul.f32 1.442695, %v1094_v58  ;;  %v1095_v62 = vmul.f32 0.5, %v1091_v59  ;;  %1465 = vst [vmem:[%s709_s25 + $0x8] sm:$0xff] %v1091_v59  ;;  %s1485_s25 = sshll.u32 %s678_s29, 4  ;;  %s2833_s25 = int_to_ptr.vmem [resolvable:$true] %s1485_s25 }
 0x360   : > { %s2223_s0 = scalar_lea.vmem %s2833_s25, 256  ;;  %p2230_p13 = scmp.lt.s32.totalorder %s2833_s25, %s2228_s7 }
 0x361   : > { %2043 = vpow2.f32 %v1096_v61  ;;  %v1098_v63 = vmul.f32 1.442695, %v1095_v62  ;;  %p2224_p4 = scmp.ne.s32.totalorder %s2833_s25, %s2223_s0 }
 0x363   : > { %2045 = vpow2.f32 %v1098_v63  ;;  %p2225_p8 = pnand %p2224_p4, %p2945_p7 }
 0x365   : > { %p2226_p11 = pneg %p2225_p8 }
 0x36b   : > { %v2044_v5 = vpop.eup %2043 }
 0x36c   : > { %1102 = vrot.lane.b32.xlu0 %v2044_v5, %s2311_s21 }
 0x36d   : > { %v2046_v9 = vpop.eup %2045 }
 0x370   : > { %1104 = vrot.lane.b32.xlu0 %v2046_v9, %s2311_s21  ;;  %s2229_s21 = scalar_lea.vmem %s2228_s7, 512 }
 0x371   : > { %p2231_p1 = scmp.lt.s32.totalorder %s2229_s21, %s2223_s0 }
 0x373   : > { %p2232_p0 = por %p2231_p1, %p2230_p13 }
 0x375   : > { %p2233_p6 = pnand %p2232_p0, %p2226_p11 }
 0x3de   : > { %v1103_v14 = vpop.permute.xlu0 %1102 }
 0x3df   : > { %v1108_v16 = vmul.f32 %v1103_v14, %v716_v13 }
 0x3e1   : > { %v1110_v19 = vadd.f32 %v1108_v16, %v1088_v55  ;;  %v1725_v55 = vld [vmem:[#allocation11] ss:$0 sm:$0xff] }
 0x3e2   : > { %v1105_v17 = vpop.permute.xlu0 %1104 }
 0x3e3   : > { %v1109_v18 = vmul.f32 %v1105_v17, %v717_v15 }
 0x3e5   : > { %v1111_v20 = vadd.f32 %v1109_v18, %v1091_v59 }
 0x3e7   : > { %v1112_v21 = vpack.c.bf16 %v1111_v20, %v1110_v19 }
 0x3e9   : > { %1856 = vmatmul.mubr.msk.bf16.vlgmr.msra.gmra.mrb[12].mxu0 %vm1166_vm4, %v1112_v21 }
 0x3ea   : > { %1895 = vmatprep.mubr.msk.bf16.mxu0 %vm2310_vm0, %v2309_v0  ;;  %1880 = vmatpush3.bf16.msra.mxu0 %v2035_v25 }
 0x3eb   : > { %1881 = vmatprep.subr.bf16.mxu0 %v2309_v0 }
 0x3ee   : > { %1882 = vmatpush3.bf16.msra.mxu0 %v2036_v26 }
 0x3ef   : > { %1883 = vmatprep.subr.bf16.mxu0 %v2309_v0 }
 0x3f2   : > { %1884 = vmatpush3.bf16.msra.mxu0 %v2037_v27 }
 0x3f3   : > { %1885 = vmatprep.subr.bf16.mxu0 %v2309_v0 }
 0x3f6   : > { %1886 = vmatpush3.bf16.msra.mxu0 %v2038_v28 }
 0x3f7   : > { %1887 = vmatprep.subr.bf16.mxu0 %v2309_v0 }
 0x3fa   : > { %1888 = vmatpush3.bf16.msra.mxu0 %v2039_v29 }
 0x3fb   : > { %1889 = vmatprep.subr.bf16.mxu0 %v2309_v0 }
 0x3fe   : > { %1890 = vmatpush3.bf16.msra.mxu0 %v2040_v30 }
 0x3ff   : > { %1891 = vmatprep.subr.bf16.mxu0 %v2309_v0 }
 0x402   : > { %1892 = vmatpush3.bf16.msra.mxu0 %v2041_v43 }
 0x403   : > { %1893 = vmatprep.subr.bf16.mxu0 %v2309_v0 }
 0x406   : > { %1894 = vmatpush3.bf16.msra.mxu0 %v2042_v44 }
 0x4bc   : > { %v1204_v31 = vpop.f32.mrb[12].mxu0 }
 0x4bd   : > { %v1205_v33 = vadd.f32 %v1204_v31, %v2754_v3  ;;  %v1857_v34 = vpop.f32.mrb[13].mxu0 }
 0x4be   : > { %v1207_v35 = vpop.f32.mrb[14].mxu0 }
 0x4bf   : > { %v1218_v36 = vadd.f32 %v1715_v32, %v1205_v33  ;;  %v1208_v37 = vadd.f32 %v1207_v35, %v2759_v7  ;;  %v1858_v38 = vpop.f32.mrb[15].mxu0 }
 0x4c1   : > { %v1219_v39 = vadd.f32 %v1715_v32, %v1208_v37  ;;  %v1220_v40 = vmax.f32 %v1218_v36, 0.0 }
 0x4c3   : > { %v1221_v41 = vmax.f32 %v1219_v39, 0.0 }
 0x4c5   : > { %v1222_v42 = vpack.c.bf16 %v1221_v41, %v1220_v40 }
 0x4c7   : > { %1876 = vmatmul.mubr.bf16.vlgmr.msra.gmra.mrb[8].mxu1 %v1222_v42 }
 0x59a   : > { %v1328_v46 = vpop.f32.mrb[8].mxu1 }
 0x59b   : > { %v1329_v47 = vadd.f32 %v1716_v45, %v1328_v46  ;;  %v1877_v48 = vpop.f32.mrb[9].mxu1 }
 0x59c   : > { %v1331_v49 = vpop.f32.mrb[10].mxu1 }
 0x59d   : > { %v1332_v50 = vadd.f32 %v1716_v45, %v1331_v49  ;;  %v1878_v51 = vpop.f32.mrb[11].mxu1  ;;  %v1335_v52 = vmax.f32 %v1329_v47, 0.0 }
 0x59f   : > { %v1336_v53 = vmax.f32 %v1332_v50, 0.0 }
 0x5a1   : > { %v1337_v54 = vpack.c.bf16 %v1336_v53, %v1335_v52 }
 0x5a3   : > { %1896 = vmatmul.mubr.bf16.vlgmr.msra.gmra.mrb[16].mxu0 %v1337_v54 }
 0x676   : > { %v1443_v56 = vpop.f32.mrb[16].mxu0 }
 0x677   : > { %v1444_v0 = vadd.f32 %v1725_v55, %v1443_v56  ;;  %v1897_v57 = vpop.f32.mrb[17].mxu0 }
 0x678   : > { %v1446_v58 = vpop.f32.mrb[18].mxu0 }
 0x679   : > { %v1734_v59 = vmul.f32 -1.442695, %v1444_v0  ;;  %v1447_v60 = vadd.f32 %v1725_v55, %v1446_v58  ;;  %v1898_v61 = vpop.f32.mrb[19].mxu0 }
 0x67b   : > { %2047 = vpow2.f32 %v1734_v59  ;;  %v1735_v62 = vmul.f32 -1.442695, %v1447_v60 }
 0x67d   : > { %2049 = vpow2.f32 %v1735_v62 }
 0x685   : > { %v2048_v63 = vpop.eup %2047 }
 0x686   : > { %v1456_v1 = vadd.f32 1.0, %v2048_v63 }
 0x687   : > { %v2050_v2 = vpop.eup %2049 }
 0x688   : > { %2051 = vrcp.f32 %v1456_v1  ;;  %v1457_v3 = vadd.f32 1.0, %v2050_v2 }
 0x68a   : > { %2053 = vrcp.f32 %v1457_v3 }
 0x692   : > { %v2052_v4 = vpop.eup %2051 }
 0x693   : > { %1462 = vst.msk [vmem:[%s678_s29] sm:$0xff] %vm810_vm3, %v2052_v4 }
 0x694   : > { %v2054_v5 = vpop.eup %2053 }
 0x695   : > { %1463 = vst.msk [vmem:[%s678_s29 + $0x8] sm:$0xff] %vm810_vm3, %v2054_v5 }
 0x696   : > { %2236 = shalt.err (!%p2233_p6)
}
 0x697   : > { %s2237_s22 = scalar_lea.hbm %s2831_s24, 256  ;;  %s2241_s28 = scalar_lea.hbm %s2944_s19, 512 }
 0x698   : > { %p2238_p5 = scmp.ne.s32.totalorder %s2831_s24, %s2237_s22  ;;  %p2242_p10 = scmp.lt.u32.totalorder %s2831_s24, %s2944_s19 }
 0x699   : > { %p2243_p2 = scmp.lt.u32.totalorder %s2241_s28, %s2237_s22  ;;  %p2245_p4 = scmp.lt.u32.totalorder %s2237_s22, %s2831_s24 }
 0x69a   : > { %p2239_p9 = pnand %p2238_p5, %p2945_p7 }
 0x69b   : > { %p2244_p3 = por %p2243_p2, %p2242_p10 }
 0x69c   : > { %p2240_p12 = pneg %p2239_p9 }
 0x69d   : > { %p2246_p8 = por %p2245_p4, %p2244_p3 }
 0x69f   : > { %p2247_p11 = pnand %p2246_p8, %p2240_p12 }
 0x6a1   : > { %2250 = shalt.err (!%p2247_p11)
}
 0x6a2   : > { %s2313_s2 = smov 128   ;;  %s2314_s30 = smov 8  }
 0x6a3   : > { %1923 = dma.vmem_to_hbm [thread:$0]  (%p2945_p7), %s2833_s25, 256, %s2831_s24, %s2837_s20, %s2313_s2, %s2313_s2, %s2314_s30  }
 0x6a4 PF: > { %s2946_s0 = sld [smem:[#allocation22_spill]]  ;;  %s2947_s17 = sld [smem:[#allocation19_spill]] }
 0x6a5   : > { %s2948_s7 = sld [smem:[#allocation26_spill]] }
 0x6aa   : > { %p1960_p13 = scmp.ge.s32.totalorder %s2946_s0, 2  ;;  %s1504_s21 = sand.u32 1, %s2947_s17  }
 0x6ab   : > { %p2949_p1 = scmp.ne.s32.totalorder %s2948_s7, 0  ;;  %s1505_s22 = scalar_lea.sflag [#allocation4], %s1504_s21 }
 0x6ad   : > { %p1945_p0 = pnand %p1960_p13, %p2949_p1 }
 0x6af   : > { %2284 = dma.done.wait (!%p1945_p0), %s1505_s22, 256  }
 0x6b0   : > { %2286 = vsyncadd (!%p1945_p0), %s1505_s22, 4294967040  ;;  %s2950_s30 = sld [smem:[#allocation23_spill]]  ;;  %s2951_s27 = sld [smem:[#allocation20_spill]] }
 0x6b1   : > { %s2952_s28 = sld [smem:[#allocation21_spill]]  ;;  %s2953_s29 = sld [smem:[#allocation24_spill]] }
 0x6b6   : > { %p33_p6 = scmp.ge.s32.totalorder %s2950_s30, 4  }
 0x6b8   :  { %35 = sbr.rel (!%p33_p6) target bundleno = 13 (0xd), region = 166 }
 0x6bf   :  { %1518 = vsyncpa [#allocation3], 1 }
 0x6c0   :  { %1520 = vsyncpa [#allocation3 + $0x1], 1 }
 0x6c1   :  { %1521 = vsyncpa [#allocation6], 1 }
 0x6c2   :  { %1522 = vsyncpa [#allocation9], 1 }
 0x6c3   :  { %1523 = vsyncpa [#allocation12], 1 }
 0x6c4   :  { %1524 = vsyncpa [#allocation4], 1 }
 0x6c5   :  { %1526 = vsyncpa [#allocation4 + $0x1], 1 }

</bundles_post_ra>
